<compile_context>
chip_gen: v7x
topology: tpu7x:2x2x1
jax: 0.10.0
libtpu: 0.0.40
codegen_flags: <defaults>
</compile_context>

<pallas_src>
import numpy as np
import jax
import jax.numpy as jnp
from jax import lax
from jax.experimental import pallas as pl
from jax.experimental.pallas import tpu as pltpu

# Module defaults (NMS class attributes).
CONF_THRES = 0.25
IOU_THRES = 0.45
MAX_WH = 4096.0     # class-offset trick used by non_max_suppression
MAX_DET = 128       # fixed detection budget (torch uses 300; 128 = one lane row)


# ------------------------------- Pallas kernel ------------------------------- #

def _make_nms_kernel(max_det, conf_thres, iou_thres, max_wh):
    """Fused decode + multi-label scoring + greedy class-aware NMS (one image/program)."""

    def kernel(pred_ref, out_ref):
        # pred_ref block: (1, 5+nc, N) — feature rows on sublanes, anchors on lanes.
        p = pred_ref[0]                                   # (5+nc, N)
        nfeat, n = p.shape
        nc = nfeat - 5

        cx, cy = p[0:1], p[1:2]
        ww, hh = p[2:3], p[3:4]
        obj = p[4:5]                                      # (1, N)
        cls = p[5:]                                       # (nc, N)

        # xywh -> xyxy (shared by all class-candidates of an anchor).
        x1 = cx - ww * 0.5
        y1 = cy - hh * 0.5
        x2 = cx + ww * 0.5
        y2 = cy + hh * 0.5

        # Multi-label candidates: one per (class, anchor) pair.
        conf = obj * cls                                  # (nc, N)
        valid = (obj > conf_thres) & (conf > conf_thres)
        scores0 = jnp.where(valid, conf, -1.0)

        cls_row = lax.broadcasted_iota(jnp.int32, (nc, n), 0)
        cls_f = cls_row.astype(jnp.float32)
        offs = cls_f * max_wh                             # class offset => class-aware NMS
        bx1, by1 = x1 + offs, y1 + offs
        bx2, by2 = x2 + offs, y2 + offs
        area = (bx2 - bx1) * (by2 - by1)                  # from offset coords (matches torchvision)

        flat_id = cls_row * n + lax.broadcasted_iota(jnp.int32, (nc, n), 1)
        slot_id = lax.broadcasted_iota(jnp.int32, (1, max_det), 1)
        big = jnp.int32(nc * n)

        def body(i, carry):
            scores, ox1, oy1, ox2, oy2, oconf, ocls, oflag = carry

            best = jnp.max(scores, keepdims=True)                      # (1, 1)
            is_det = best > 0.0                                        # live candidate left?
            idx = jnp.min(jnp.where(scores == best, flat_id, big), keepdims=True)
            oh = flat_id == idx                                        # one-hot (nc, N)
            ohf = oh.astype(jnp.float32)

            def sel(a):                                                # exact element extract
                return jnp.sum(a * ohf, keepdims=True)                 # (1, 1)

            sx1, sy1, sx2, sy2 = sel(x1), sel(y1), sel(x2), sel(y2)
            scl = sel(cls_f)
            soff = scl * max_wh
            sbx1, sby1 = sx1 + soff, sy1 + soff
            sbx2, sby2 = sx2 + soff, sy2 + soff
            sarea = (sbx2 - sbx1) * (sby2 - sby1)

            # Write detection slot i with a lane-masked select (no dynamic stores).
            cmask = (slot_id == i) & is_det                            # (1, max_det)
            ox1 = jnp.where(cmask, sx1, ox1)
            oy1 = jnp.where(cmask, sy1, oy1)
            ox2 = jnp.where(cmask, sx2, ox2)
            oy2 = jnp.where(cmask, sy2, oy2)
            oconf = jnp.where(cmask, best, oconf)
            ocls = jnp.where(cmask, scl, ocls)
            oflag = jnp.where(cmask, 1.0, oflag)

            # Suppress IoU(selected, all) > thr, evaluated as inter > thr * union (no divide).
            ix1 = jnp.maximum(bx1, sbx1)
            iy1 = jnp.maximum(by1, sby1)
            ix2 = jnp.minimum(bx2, sbx2)
            iy2 = jnp.minimum(by2, sby2)
            inter = jnp.maximum(ix2 - ix1, 0.0) * jnp.maximum(iy2 - iy1, 0.0)
            union = area + sarea - inter
            suppress = is_det & (inter > iou_thres * union)
            scores = jnp.where(suppress | oh, -1.0, scores)
            return scores, ox1, oy1, ox2, oy2, oconf, ocls, oflag

        zrow = jnp.zeros((1, max_det), jnp.float32)
        carry = (scores0, zrow, zrow, zrow, zrow, zrow, zrow, zrow)
        carry = lax.fori_loop(0, max_det, body, carry)
        _, ox1, oy1, ox2, oy2, oconf, ocls, oflag = carry

        out_ref[0] = jnp.concatenate(
            [ox1, oy1, ox2, oy2, oconf, ocls, oflag, zrow], axis=0)    # (8, max_det)

    return kernel


# --------------------------------- wrappers ---------------------------------- #

def non_max_suppression_pallas(prediction, conf_thres=CONF_THRES, iou_thres=IOU_THRES,
                               max_det=MAX_DET, max_wh=MAX_WH):
    """prediction: (B, N, 5+nc) -> (dets (B,max_det,6), valid (B,max_det), counts (B,))."""
    b, n, nfeat = prediction.shape
    # Put anchors on the lane axis for the kernel.
    # TODO(synk): fold this transpose into the kernel's BlockSpec for very large N.
    pred_t = jnp.transpose(prediction.astype(jnp.float32), (0, 2, 1))   # (B, 5+nc, N)

    out = pl.pallas_call(
        _make_nms_kernel(max_det, conf_thres, iou_thres, max_wh),
        out_shape=jax.ShapeDtypeStruct((b, 8, max_det), jnp.float32),
        grid=(b,),
        in_specs=[pl.BlockSpec((1, nfeat, n), lambda i: (i, 0, 0))],
        out_specs=pl.BlockSpec((1, 8, max_det), lambda i: (i, 0, 0)),
        compiler_params=pltpu.CompilerParams(dimension_semantics=("parallel",)),
    )(pred_t)

    dets = jnp.transpose(out[:, 0:6, :], (0, 2, 1))      # (B, max_det, 6): x1,y1,x2,y2,conf,cls
    valid = out[:, 6, :] > 0.5                           # (B, max_det)
    counts = jnp.sum(valid.astype(jnp.int32), axis=1)    # (B,)
    return dets, valid, counts


def nms_module_forward(x):
    """Mirrors NMS.forward: non_max_suppression on x[0] with the class defaults."""
    # TODO(synk): classes-filter / agnostic / merge-NMS and the max_nms=30000 &
    # time-limit caps of the torch helper are not replicated (inactive at the
    # module defaults); variable-length per-image output lists become a fixed
    # (max_det, 6) slab plus validity mask / count.
    return non_max_suppression_pallas(x[0])


# ------------------------------ numpy reference ------------------------------ #

def _xywh2xyxy(xywh):
    out = np.empty_like(xywh)
    out[:, 0] = xywh[:, 0] - xywh[:, 2] * 0.5
    out[:, 1] = xywh[:, 1] - xywh[:, 3] * 0.5
    out[:, 2] = xywh[:, 0] + xywh[:, 2] * 0.5
    out[:, 3] = xywh[:, 1] + xywh[:, 3] * 0.5
    return out


def nms_reference(prediction, conf_thres, iou_thres, max_det, max_wh):
    """Numpy port of yolov5 non_max_suppression (multi_label, classes=None, agnostic=False)."""
    pred = np.asarray(prediction, dtype=np.float32)
    outputs = []
    for x in pred:
        x = x[x[:, 4] > conf_thres]                       # objectness candidates
        if x.shape[0] == 0:
            outputs.append(np.zeros((0, 6), np.float32)); continue
        box = _xywh2xyxy(x[:, :4])
        conf_mat = x[:, 5:] * x[:, 4:5]                   # obj * cls
        ii, jj = np.nonzero(conf_mat > conf_thres)        # multi-label candidates
        dets = np.concatenate([box[ii], conf_mat[ii, jj][:, None],
                               jj[:, None].astype(np.float32)], axis=1)
        if dets.shape[0] == 0:
            outputs.append(np.zeros((0, 6), np.float32)); continue
        order = np.argsort(-dets[:, 4], kind="stable")
        dets = dets[order]
        off = dets[:, 5:6] * np.float32(max_wh)
        bxs = dets[:, :4] + off
        areas = (bxs[:, 2] - bxs[:, 0]) * (bxs[:, 3] - bxs[:, 1])
        suppressed = np.zeros(dets.shape[0], dtype=bool)
        keep = []
        for i in range(dets.shape[0]):
            if suppressed[i]:
                continue
            keep.append(i)
            if len(keep) == max_det:
                break
            ix1 = np.maximum(bxs[i, 0], bxs[:, 0])
            iy1 = np.maximum(bxs[i, 1], bxs[:, 1])
            ix2 = np.minimum(bxs[i, 2], bxs[:, 2])
            iy2 = np.minimum(bxs[i, 3], bxs[:, 3])
            inter = np.maximum(ix2 - ix1, 0.0) * np.maximum(iy2 - iy1, 0.0)
            union = areas[i] + areas - inter
            suppressed |= inter > np.float32(iou_thres) * union
        outputs.append(dets[keep])
    return outputs


# ------------------------------------ main ----------------------------------- #

if __name__ == "__main__":
    B, N, NC = 2, 256, 3
    key = jax.random.PRNGKey(0)
    kcx, kcy, kw, kh, ko, kc = jax.random.split(key, 6)

    # Synthetic detect-head output: boxes crowded on a 160x160 canvas so the IoU
    # suppression path is exercised; obj/cls confidences in (0, 1).
    cx = jax.random.uniform(kcx, (B, N), jnp.float32, 20.0, 140.0)
    cy = jax.random.uniform(kcy, (B, N), jnp.float32, 20.0, 140.0)
    ww = jax.random.uniform(kw, (B, N), jnp.float32, 20.0, 80.0)
    hh = jax.random.uniform(kh, (B, N), jnp.float32, 20.0, 80.0)
    obj = jax.nn.sigmoid(2.0 * jax.random.normal(ko, (B, N), jnp.float32))
    cls = jax.nn.sigmoid(2.0 * jax.random.normal(kc, (B, N, NC), jnp.float32))
    pred = jnp.concatenate([jnp.stack([cx, cy, ww, hh, obj], axis=-1), cls], axis=-1)

    # NMS.forward(x) == non_max_suppression(x[0], ...): x is the detect-head tuple.
    dets, valid, counts = nms_module_forward((pred, None))
    dets = np.asarray(jax.block_until_ready(dets))
    valid = np.asarray(valid)
    counts = np.asarray(counts)
    assert dets.shape == (B, MAX_DET, 6), dets.shape

    ref = nms_reference(np.asarray(pred), CONF_THRES, IOU_THRES, MAX_DET, MAX_WH)

    for bi in range(B):
        k = int(counts[bi])
        assert k == ref[bi].shape[0], (bi, k, ref[bi].shape[0])
        assert not valid[bi, k:].any(), bi
        if k:
            err = float(np.max(np.abs(dets[bi, :k] - ref[bi])))
            assert err < 1e-3, (bi, err)
    assert counts.min() > 0, counts     # the test must actually produce detections
    print("KERNEL_OK")
</pallas_src>

<mosaic_0001>
module attributes {stable_mosaic.version = 11 : i64} {
  func.func @kernel(%arg0: i32, %arg1: memref<1x8x256xf32, #tpu.memory_space<vmem>>, %arg2: memref<1x8x128xf32, #tpu.memory_space<vmem>>) attributes {dimension_semantics = [#tpu.dimension_semantics<parallel>], iteration_bounds = array<i64: 2>, scalar_prefetch = 0 : i64, scratch_operands = 0 : i64, tpu.core_type = #tpu.core_type<tc>, window_params = [{transform_indices = @transform_0, window_bounds = array<i64: 1, 8, 256>}, {transform_indices = @transform_1, window_bounds = array<i64: 1, 8, 128>}]} {
    %c0 = arith.constant 0 : index
    %c0_0 = arith.constant 0 : index
    %c0_1 = arith.constant 0 : index
    %0 = vector.load %arg1[%c0, %c0_0, %c0_1] : memref<1x8x256xf32, #tpu.memory_space<vmem>>, vector<1x8x256xf32>
    %1 = vector.shape_cast %0 : vector<1x8x256xf32> to vector<8x256xf32>
    %2 = vector.extract_strided_slice %1 {offsets = [0, 0], sizes = [1, 256], strides = [1, 1]} : vector<8x256xf32> to vector<1x256xf32>
    %3 = vector.extract_strided_slice %1 {offsets = [1, 0], sizes = [1, 256], strides = [1, 1]} : vector<8x256xf32> to vector<1x256xf32>
    %4 = vector.extract_strided_slice %1 {offsets = [2, 0], sizes = [1, 256], strides = [1, 1]} : vector<8x256xf32> to vector<1x256xf32>
    %5 = vector.extract_strided_slice %1 {offsets = [3, 0], sizes = [1, 256], strides = [1, 1]} : vector<8x256xf32> to vector<1x256xf32>
    %6 = vector.extract_strided_slice %1 {offsets = [4, 0], sizes = [1, 256], strides = [1, 1]} : vector<8x256xf32> to vector<1x256xf32>
    %7 = vector.extract_strided_slice %1 {offsets = [5, 0], sizes = [3, 256], strides = [1, 1]} : vector<8x256xf32> to vector<3x256xf32>
    %cst = arith.constant 5.000000e-01 : f32
    %8 = vector.broadcast %cst : f32 to vector<1x256xf32>
    %9 = arith.mulf %4, %8 : vector<1x256xf32>
    %10 = arith.subf %2, %9 : vector<1x256xf32>
    %cst_2 = arith.constant 5.000000e-01 : f32
    %11 = vector.broadcast %cst_2 : f32 to vector<1x256xf32>
    %12 = arith.mulf %5, %11 : vector<1x256xf32>
    %13 = arith.subf %3, %12 : vector<1x256xf32>
    %cst_3 = arith.constant 5.000000e-01 : f32
    %14 = vector.broadcast %cst_3 : f32 to vector<1x256xf32>
    %15 = arith.mulf %4, %14 : vector<1x256xf32>
    %16 = arith.addf %2, %15 : vector<1x256xf32>
    %cst_4 = arith.constant 5.000000e-01 : f32
    %17 = vector.broadcast %cst_4 : f32 to vector<1x256xf32>
    %18 = arith.mulf %5, %17 : vector<1x256xf32>
    %19 = arith.addf %3, %18 : vector<1x256xf32>
    %20 = vector.broadcast %6 : vector<1x256xf32> to vector<3x256xf32>
    %21 = arith.mulf %20, %7 : vector<3x256xf32>
    %cst_5 = arith.constant 2.500000e-01 : f32
    %22 = vector.broadcast %cst_5 : f32 to vector<1x256xf32>
    %23 = arith.cmpf ogt, %6, %22 : vector<1x256xf32>
    %cst_6 = arith.constant 2.500000e-01 : f32
    %24 = vector.broadcast %cst_6 : f32 to vector<3x256xf32>
    %25 = arith.cmpf ogt, %21, %24 : vector<3x256xf32>
    %26 = vector.broadcast %23 : vector<1x256xi1> to vector<3x256xi1>
    %27 = arith.andi %26, %25 : vector<3x256xi1>
    %cst_7 = arith.constant -1.000000e+00 : f32
    %28 = vector.broadcast %cst_7 : f32 to vector<3x256xf32>
    %29 = arith.select %27, %21, %28 : vector<3x256xi1>, vector<3x256xf32>
    %30 = tpu.iota {dimensions = array<i32: 0>} : vector<3x256xi32>
    %31 = arith.sitofp %30 : vector<3x256xi32> to vector<3x256xf32>
    %cst_8 = arith.constant 4.096000e+03 : f32
    %32 = vector.broadcast %cst_8 : f32 to vector<3x256xf32>
    %33 = arith.mulf %31, %32 : vector<3x256xf32>
    %34 = vector.broadcast %10 : vector<1x256xf32> to vector<3x256xf32>
    %35 = arith.addf %34, %33 : vector<3x256xf32>
    %36 = vector.broadcast %13 : vector<1x256xf32> to vector<3x256xf32>
    %37 = arith.addf %36, %33 : vector<3x256xf32>
    %38 = vector.broadcast %16 : vector<1x256xf32> to vector<3x256xf32>
    %39 = arith.addf %38, %33 : vector<3x256xf32>
    %40 = vector.broadcast %19 : vector<1x256xf32> to vector<3x256xf32>
    %41 = arith.addf %40, %33 : vector<3x256xf32>
    %42 = arith.subf %39, %35 : vector<3x256xf32>
    %43 = arith.subf %41, %37 : vector<3x256xf32>
    %44 = arith.mulf %42, %43 : vector<3x256xf32>
    %c256_i32 = arith.constant 256 : i32
    %45 = vector.broadcast %c256_i32 : i32 to vector<3x256xi32>
    %46 = arith.muli %30, %45 : vector<3x256xi32>
    %47 = tpu.iota {dimensions = array<i32: 1>} : vector<3x256xi32>
    %48 = arith.addi %46, %47 : vector<3x256xi32>
    %49 = tpu.iota {dimensions = array<i32: 1>} : vector<1x128xi32>
    %cst_9 = arith.constant 0.000000e+00 : f32
    %50 = vector.broadcast %cst_9 : f32 to vector<1x128xf32>
    %c768_i32 = arith.constant 768 : i32
    %c0_i32 = arith.constant 0 : i32
    %c128_i32 = arith.constant 128 : i32
    %51 = arith.addi %c0_i32, %c128_i32 : i32
    %c1_i32 = arith.constant 1 : i32
    %52:8 = scf.for %arg3 = %c0_i32 to %51 step %c1_i32 iter_args(%arg4 = %29, %arg5 = %50, %arg6 = %50, %arg7 = %50, %arg8 = %50, %arg9 = %50, %arg10 = %50, %arg11 = %50) -> (vector<3x256xf32>, vector<1x128xf32>, vector<1x128xf32>, vector<1x128xf32>, vector<1x128xf32>, vector<1x128xf32>, vector<1x128xf32>, vector<1x128xf32>)  : i32 {
      %57 = vector.shape_cast %arg4 : vector<3x256xf32> to vector<1x3x256xf32>
      %cst_14 = arith.constant dense<0xFF800000> : vector<1xf32>
      %58 = vector.multi_reduction <maximumf>, %57, %cst_14 [1, 2] : vector<1x3x256xf32> to vector<1xf32>
      %59 = vector.shape_cast %58 : vector<1xf32> to vector<1x1x1xf32>
      %60 = vector.extract %59[0, 0, 0] : f32 from vector<1x1x1xf32>
      %61 = vector.broadcast %60 : f32 to vector<1x1xf32>
      %cst_15 = arith.constant 0.000000e+00 : f32
      %62 = vector.broadcast %cst_15 : f32 to vector<1x1xf32>
      %63 = arith.cmpf ogt, %61, %62 : vector<1x1xf32>
      %64 = vector.broadcast %61 : vector<1x1xf32> to vector<3x256xf32>
      %65 = arith.cmpf oeq, %arg4, %64 : vector<3x256xf32>
      %66 = vector.broadcast %c768_i32 : i32 to vector<3x256xi32>
      %67 = arith.select %65, %48, %66 : vector<3x256xi1>, vector<3x256xi32>
      %68 = vector.shape_cast %67 : vector<3x256xi32> to vector<1x3x256xi32>
      %cst_16 = arith.constant dense<2147483647> : vector<1xi32>
      %69 = vector.multi_reduction <minsi>, %68, %cst_16 [1, 2] : vector<1x3x256xi32> to vector<1xi32>
      %70 = vector.shape_cast %69 : vector<1xi32> to vector<1x1x1xi32>
      %71 = vector.extract %70[0, 0, 0] : i32 from vector<1x1x1xi32>
      %72 = vector.broadcast %71 : i32 to vector<1x1xi32>
      %73 = vector.broadcast %72 : vector<1x1xi32> to vector<3x256xi32>
      %74 = arith.cmpi eq, %48, %73 : vector<3x256xi32>
      %75 = arith.extui %74 : vector<3x256xi1> to vector<3x256xi32>
      %76 = arith.sitofp %75 : vector<3x256xi32> to vector<3x256xf32>
      %77 = vector.broadcast %10 : vector<1x256xf32> to vector<3x256xf32>
      %78 = arith.mulf %77, %76 : vector<3x256xf32>
      %79 = vector.shape_cast %78 : vector<3x256xf32> to vector<1x3x256xf32>
      %cst_17 = arith.constant dense<0.000000e+00> : vector<1xf32>
      %80 = vector.multi_reduction <add>, %79, %cst_17 [1, 2] : vector<1x3x256xf32> to vector<1xf32>
      %81 = vector.shape_cast %80 : vector<1xf32> to vector<1x1x1xf32>
      %82 = vector.extract %81[0, 0, 0] : f32 from vector<1x1x1xf32>
      %83 = vector.broadcast %82 : f32 to vector<1x1xf32>
      %84 = vector.broadcast %13 : vector<1x256xf32> to vector<3x256xf32>
      %85 = arith.mulf %84, %76 : vector<3x256xf32>
      %86 = vector.shape_cast %85 : vector<3x256xf32> to vector<1x3x256xf32>
      %cst_18 = arith.constant dense<0.000000e+00> : vector<1xf32>
      %87 = vector.multi_reduction <add>, %86, %cst_18 [1, 2] : vector<1x3x256xf32> to vector<1xf32>
      %88 = vector.shape_cast %87 : vector<1xf32> to vector<1x1x1xf32>
      %89 = vector.extract %88[0, 0, 0] : f32 from vector<1x1x1xf32>
      %90 = vector.broadcast %89 : f32 to vector<1x1xf32>
      %91 = vector.broadcast %16 : vector<1x256xf32> to vector<3x256xf32>
      %92 = arith.mulf %91, %76 : vector<3x256xf32>
      %93 = vector.shape_cast %92 : vector<3x256xf32> to vector<1x3x256xf32>
      %cst_19 = arith.constant dense<0.000000e+00> : vector<1xf32>
      %94 = vector.multi_reduction <add>, %93, %cst_19 [1, 2] : vector<1x3x256xf32> to vector<1xf32>
      %95 = vector.shape_cast %94 : vector<1xf32> to vector<1x1x1xf32>
      %96 = vector.extract %95[0, 0, 0] : f32 from vector<1x1x1xf32>
      %97 = vector.broadcast %96 : f32 to vector<1x1xf32>
      %98 = vector.broadcast %19 : vector<1x256xf32> to vector<3x256xf32>
      %99 = arith.mulf %98, %76 : vector<3x256xf32>
      %100 = vector.shape_cast %99 : vector<3x256xf32> to vector<1x3x256xf32>
      %cst_20 = arith.constant dense<0.000000e+00> : vector<1xf32>
      %101 = vector.multi_reduction <add>, %100, %cst_20 [1, 2] : vector<1x3x256xf32> to vector<1xf32>
      %102 = vector.shape_cast %101 : vector<1xf32> to vector<1x1x1xf32>
      %103 = vector.extract %102[0, 0, 0] : f32 from vector<1x1x1xf32>
      %104 = vector.broadcast %103 : f32 to vector<1x1xf32>
      %105 = arith.mulf %31, %76 : vector<3x256xf32>
      %106 = vector.shape_cast %105 : vector<3x256xf32> to vector<1x3x256xf32>
      %cst_21 = arith.constant dense<0.000000e+00> : vector<1xf32>
      %107 = vector.multi_reduction <add>, %106, %cst_21 [1, 2] : vector<1x3x256xf32> to vector<1xf32>
      %108 = vector.shape_cast %107 : vector<1xf32> to vector<1x1x1xf32>
      %109 = vector.extract %108[0, 0, 0] : f32 from vector<1x1x1xf32>
      %110 = vector.broadcast %109 : f32 to vector<1x1xf32>
      %cst_22 = arith.constant 4.096000e+03 : f32
      %111 = vector.broadcast %cst_22 : f32 to vector<1x1xf32>
      %112 = arith.mulf %110, %111 : vector<1x1xf32>
      %113 = arith.addf %83, %112 : vector<1x1xf32>
      %114 = arith.addf %90, %112 : vector<1x1xf32>
      %115 = arith.addf %97, %112 : vector<1x1xf32>
      %116 = arith.addf %104, %112 : vector<1x1xf32>
      %117 = arith.subf %115, %113 : vector<1x1xf32>
      %118 = arith.subf %116, %114 : vector<1x1xf32>
      %119 = arith.mulf %117, %118 : vector<1x1xf32>
      %120 = vector.broadcast %arg3 : i32 to vector<1x128xi32>
      %121 = arith.cmpi eq, %49, %120 : vector<1x128xi32>
      %122 = vector.broadcast %63 : vector<1x1xi1> to vector<1x128xi1>
      %123 = arith.andi %121, %122 : vector<1x128xi1>
      %124 = vector.shape_cast %83 : vector<1x1xf32> to vector<1x1xf32>
      %125 = vector.broadcast %124 : vector<1x1xf32> to vector<1x128xf32>
      %126 = arith.select %123, %125, %arg5 : vector<1x128xi1>, vector<1x128xf32>
      %127 = vector.shape_cast %90 : vector<1x1xf32> to vector<1x1xf32>
      %128 = vector.broadcast %127 : vector<1x1xf32> to vector<1x128xf32>
      %129 = arith.select %123, %128, %arg6 : vector<1x128xi1>, vector<1x128xf32>
      %130 = vector.shape_cast %97 : vector<1x1xf32> to vector<1x1xf32>
      %131 = vector.broadcast %130 : vector<1x1xf32> to vector<1x128xf32>
      %132 = arith.select %123, %131, %arg7 : vector<1x128xi1>, vector<1x128xf32>
      %133 = vector.shape_cast %104 : vector<1x1xf32> to vector<1x1xf32>
      %134 = vector.broadcast %133 : vector<1x1xf32> to vector<1x128xf32>
      %135 = arith.select %123, %134, %arg8 : vector<1x128xi1>, vector<1x128xf32>
      %136 = vector.shape_cast %61 : vector<1x1xf32> to vector<1x1xf32>
      %137 = vector.broadcast %136 : vector<1x1xf32> to vector<1x128xf32>
      %138 = arith.select %123, %137, %arg9 : vector<1x128xi1>, vector<1x128xf32>
      %139 = vector.shape_cast %110 : vector<1x1xf32> to vector<1x1xf32>
      %140 = vector.broadcast %139 : vector<1x1xf32> to vector<1x128xf32>
      %141 = arith.select %123, %140, %arg10 : vector<1x128xi1>, vector<1x128xf32>
      %cst_23 = arith.constant 1.000000e+00 : f32
      %142 = vector.broadcast %cst_23 : f32 to vector<1x128xf32>
      %143 = arith.select %123, %142, %arg11 : vector<1x128xi1>, vector<1x128xf32>
      %144 = vector.broadcast %113 : vector<1x1xf32> to vector<3x256xf32>
      %145 = arith.maximumf %35, %144 : vector<3x256xf32>
      %146 = vector.broadcast %114 : vector<1x1xf32> to vector<3x256xf32>
      %147 = arith.maximumf %37, %146 : vector<3x256xf32>
      %148 = vector.broadcast %115 : vector<1x1xf32> to vector<3x256xf32>
      %149 = arith.minimumf %39, %148 : vector<3x256xf32>
      %150 = vector.broadcast %116 : vector<1x1xf32> to vector<3x256xf32>
      %151 = arith.minimumf %41, %150 : vector<3x256xf32>
      %152 = arith.subf %149, %145 : vector<3x256xf32>
      %cst_24 = arith.constant 0.000000e+00 : f32
      %153 = vector.broadcast %cst_24 : f32 to vector<3x256xf32>
      %154 = arith.maximumf %152, %153 : vector<3x256xf32>
      %155 = arith.subf %151, %147 : vector<3x256xf32>
      %cst_25 = arith.constant 0.000000e+00 : f32
      %156 = vector.broadcast %cst_25 : f32 to vector<3x256xf32>
      %157 = arith.maximumf %155, %156 : vector<3x256xf32>
      %158 = arith.mulf %154, %157 : vector<3x256xf32>
      %159 = vector.broadcast %119 : vector<1x1xf32> to vector<3x256xf32>
      %160 = arith.addf %44, %159 : vector<3x256xf32>
      %161 = arith.subf %160, %158 : vector<3x256xf32>
      %cst_26 = arith.constant 4.500000e-01 : f32
      %162 = vector.broadcast %cst_26 : f32 to vector<3x256xf32>
      %163 = arith.mulf %162, %161 : vector<3x256xf32>
      %164 = arith.cmpf ogt, %158, %163 : vector<3x256xf32>
      %165 = vector.broadcast %63 : vector<1x1xi1> to vector<3x256xi1>
      %166 = arith.andi %165, %164 : vector<3x256xi1>
      %167 = arith.ori %166, %74 : vector<3x256xi1>
      %cst_27 = arith.constant -1.000000e+00 : f32
      %168 = vector.broadcast %cst_27 : f32 to vector<3x256xf32>
      %169 = arith.select %167, %168, %arg4 : vector<3x256xi1>, vector<3x256xf32>
      scf.yield %169, %126, %129, %132, %135, %138, %141, %143 : vector<3x256xf32>, vector<1x128xf32>, vector<1x128xf32>, vector<1x128xf32>, vector<1x128xf32>, vector<1x128xf32>, vector<1x128xf32>, vector<1x128xf32>
    }
    %c128_i32_10 = arith.constant 128 : i32
    %53 = tpu.concatenate %52#1, %52#2, %52#3, %52#4, %52#5, %52#6, %52#7, %50 in 0 : vector<1x128xf32>, vector<1x128xf32>, vector<1x128xf32>, vector<1x128xf32>, vector<1x128xf32>, vector<1x128xf32>, vector<1x128xf32>, vector<1x128xf32> -> vector<8x128xf32>
    %c0_11 = arith.constant 0 : index
    %c0_12 = arith.constant 0 : index
    %c0_13 = arith.constant 0 : index
    %54 = vector.load %arg2[%c0_11, %c0_12, %c0_13] : memref<1x8x128xf32, #tpu.memory_space<vmem>>, vector<1x8x128xf32>
    %55 = vector.shape_cast %54 : vector<1x8x128xf32> to vector<8x128xf32>
    %56 = vector.shape_cast %53 : vector<8x128xf32> to vector<1x8x128xf32>
    tpu.vector_store %arg2[%c0_11, %c0_12, %c0_13], %56 {strides = array<i32>} : memref<1x8x128xf32, #tpu.memory_space<vmem>>, vector<1x8x128xf32>,
    return
  }
  func.func @transform_0(%arg0: i32) -> (i32, i32, i32) {
    %c0_i32 = arith.constant 0 : i32
    %c0_i32_0 = arith.constant 0 : i32
    %c0_i32_1 = arith.constant 0 : i32
    return %arg0, %c0_i32, %c0_i32_0 : i32, i32, i32
  }
  func.func @transform_1(%arg0: i32) -> (i32, i32, i32) {
    %c0_i32 = arith.constant 0 : i32
    %c0_i32_0 = arith.constant 0 : i32
    %c0_i32_1 = arith.constant 0 : i32
    return %arg0, %c0_i32, %c0_i32_0 : i32, i32, i32
  }
}

</mosaic_0001>

<bundles_post_ra>
// kernel: tpu_custom_call.1
= control target key start
LH: loop header
LB: loop body
LE: loop exit
PB: predicated region body
PF: predicated region fallthrough
CT: control target
= control target key end

     0   :  { %6 = vsyncpa [#allocation3], 0  ;;  %s1341_s0 = inlined_call_operand.hbm [shape: f32[2,8,256], index: 0, kind: input, shape index: {}]   ;;  %s1342_s1 = inlined_call_operand.hbm [shape: f32[2,8,128], index: 1, kind: output, shape index: {}]  }
   0x1   :  { %8 = vsyncpa [#allocation3 + $0x1], 0 }
   0x2   :  { %9 = vsyncpa [#allocation4], 0 }
   0x3   :  { %11 = vsyncpa [#allocation4 + $0x1], 0  ;;  %s916_s6 = smov 0   ;;  %s918_s7 = smov 0  }
   0x4   :  { %s920_s8 = smov 0   ;;  %s922_s9 = smov 0  }
   0x5 LB: > { %s937_s10 = sadd.s32 4294967295, %s860_s9   ;;  %s566_s11 = sadd.s32 4294967294, %s860_s9   ;;  %s860_s9 = sphi %s922_s9, %s1377_s9   ;;  %s856_s8 = sphi %s920_s8, %s1376_s8   ;;  %s852_s7 = sphi %s918_s7, %s1375_s7   ;;  %s848_s6 = sphi %s916_s6, %s1374_s6  }
   0x6   : > { %s941_s12 = sadd.s32 1, %s860_s9   ;;  %s24_s13 = sadd.s32 1, %s856_s8 }
   0x7   : > { %s21_s14 = ssub.s32 %s860_s9, %s941_s12  ;;  %p31_p0 = scmp.ne.s32.totalorder %s856_s8, %s852_s7 }
   0x8   : > { %p22_p1 = scmp.eq.s32.totalorder %s21_s14, 0  ;;  %p32_p2 = scmp.eq.s32.totalorder %s860_s9, 0 }
   0x9   : > { %p37_p3 = scmp.ne.s32.totalorder %s852_s7, %s848_s6  ;;  %p38_p4 = scmp.eq.s32.totalorder %s937_s10, 0 }
   0xa   : > { %s953_s15 = scalar_select %p22_p1, %s856_s8, %s24_s13  }
   0xb   : > { %p955_p5 = por %p32_p2, %p31_p0  ;;  %p959_p6 = por %p38_p4, %p37_p3 }
   0xc   : > { %p61_p7 = scmp.eq.s32.totalorder %s937_s10, 1  ;;  %p67_p8 = scmp.eq.s32.totalorder %s566_s11, 1 }
   0xd   : > { %p608_p10 = scmp.lt.s32.totalorder %s860_s9, 2  ;;  %s87_s20 = sand.u32 1, %s856_s8  }
   0xe   : > { %p966_p11 = por %p61_p7, %p31_p0  ;;  %p970_p12 = por %p67_p8, %p37_p3 }
   0xf   : > { %s581_s21 = sshll.u32 %s860_s9, 8  ;;  %s569_s22 = sshll.u32 %s87_s20, 4 }
  0x10   : > { %s1346_s18 = scalar_select %p966_p11, 1, 0 }
  0x11   : > { %s1347_s19 = scalar_select %p970_p12, 1, 0 }
  0x12   : > { %s979_s25 = scalar_lea.hbm %s1341_s0, %s581_s21  ;;  %s91_s26 = scalar_lea.vmem [#allocation2], %s569_s22 }
  0x13   : > { %s99_s27 = sshll.u32 %s91_s26, 4  ;;  %p983_p13 = pnand %p608_p10, %p955_p5  ;;  %s987_s27 = int_to_ptr.vmem [resolvable:$true] %s99_s27 }
  0x14   : > { %s88_s29 = scalar_lea.sflag [#allocation3], %s87_s20  ;;  %s724_s30 = scalar_lea.hbm %s979_s25, 256 }
  0x15   : > { %p725_p2 = scmp.ne.s32.totalorder %s979_s25, %s724_s30  ;;  %p726_p3 = pneg %p983_p13 }
  0x16   : > { %s729_s4 = scalar_lea.hbm %s1341_s0, 512  ;;  %p730_p5 = scmp.lt.u32.totalorder %s979_s25, %s1341_s0 }
  0x17   : > { %p727_p4 = pnand %p726_p3, %p725_p2  ;;  %p731_p8 = scmp.lt.u32.totalorder %s729_s4, %s724_s30 }
  0x18   : > { %p733_p9 = scmp.lt.u32.totalorder %s724_s30, %s979_s25 }
  0x19   : > { %p728_p7 = pneg %p727_p4  ;;  %p732_p10 = por %p731_p8, %p730_p5 }
  0x1b   : > { %p734_p0 = por %p733_p9, %p732_p10 }
  0x1d   : > { %p735_p1 = pnand %p734_p0, %p728_p7 }
  0x1f   : > { %738 = shalt.err (!%p735_p1)
}
  0x20   : > { %s739_s13 = scalar_lea.vmem %s987_s27, 256  ;;  %s902_s14 = smov [#allocation2]  }
  0x21   : > { %p740_p2 = scmp.ne.s32.totalorder %s987_s27, %s739_s13  ;;  %s744_s16 = sshll.u32 %s902_s14, 4  ;;  %s745_s16 = int_to_ptr.vmem [resolvable:$false] %s744_s16 }
  0x22   : > { %s746_s20 = scalar_lea.vmem %s745_s16, 512  ;;  %p747_p11 = scmp.lt.s32.totalorder %s987_s27, %s745_s16 }
  0x23   : > { %p742_p4 = pnand %p740_p2, %p726_p3  ;;  %p748_p5 = scmp.lt.s32.totalorder %s746_s20, %s739_s13 }
  0x25   : > { %p743_p12 = pneg %p742_p4  ;;  %p749_p8 = por %p748_p5, %p747_p11 }
  0x27   : > { %p750_p9 = pnand %p749_p8, %p743_p12 }
  0x29   : > { %753 = shalt.err (!%p750_p9)
}
  0x2a   : > { %603 = dma.hbm_to_vmem [thread:$0]  (!%p983_p13), %s979_s25, 256, %s987_s27, %s88_s29  }
  0x2b   : > { %p1349_p0 = scmp.lt.s32.totalorder %s860_s9, 3  ;;  %p1350_p1 = scmp.ge.s32.totalorder %s860_s9, 1 }
  0x2d   : > { %p105_p3 = pnand %p1350_p1, %p1349_p0 }
  0x2e   : > { %s1021_s21 = sand.u32 (!%p105_p3), 1, %s852_s7  }
  0x2f   : > { %108 = sbr.rel (%p105_p3) target bundleno = 908 (0x38c), region = 24  ;;  %s573_s22 = sshll.u32 (!%p105_p3), %s1021_s21, 4 }
  0x30   : > { %s111_s23 = scalar_lea.sflag (!%p105_p3), [#allocation3], %s1021_s21  ;;  %s114_s24 = scalar_lea.vmem (!%p105_p3), [#allocation2], %s573_s22 }
  0x36   : > { %839 = dma.done.wait (%p959_p6), %s111_s23, 256  }
  0x37   : > { %841 = vsyncadd (%p959_p6), %s111_s23, 4294967040  ;;  %s574_s25 = sshll.u32 %s1021_s21, 3  ;;  %v147_v0 = vlaneseq  ;;  %v133_v6 = vld [vmem:[%s114_s24] sm:$0xff]  ;;  %v134_v7 = vld [vmem:[%s114_s24 + $0x8] sm:$0xff]  ;;  %v903_v21 = vmov 0   ;;  %v1098_v57 = vmov 0.0  }
  0x38   : > { %v135_v11 = vmul.f32 0.5, %v133_v6  ;;  %v136_v12 = vmul.f32 0.5, %v134_v7  ;;  %vm157_vm0 = vcmp.gt.f32.partialorder %v133_v6, 0.25  ;;  %vm158_vm1 = vcmp.gt.f32.partialorder %v134_v7, 0.25  ;;  %s1096_s17 = scalar_lea.vmem [#allocation5], %s574_s25  ;;  %s1116_s26 = smov 0  }
  0x39   : > { %v148_v1 = vshrl.u32 %v147_v0, 7  ;;  %v1030_v2 = vand.u32 127, %v147_v0  ;;  %v161_v22 = vsel %vm157_vm0, 1, %v903_v21  ;;  %v162_v23 = vsel %vm158_vm1, 1, %v903_v21 }
  0x3a   : > { %v139_v17 = vrot.slane %v135_v11, 2  ;;  %v140_v18 = vrot.slane %v136_v12, 2  ;;  %v1100_v58 = vmov 0.0   ;;  %v1102_v59 = vmov 0.0  }
  0x3b   : > { %v149_v3 = vsub.s32 4, %v148_v1  ;;  %v227_v4 = vmul.u32 256, %v148_v1  ;;  %v230_v5 = vadd.s32 128, %v1030_v2  ;;  %v1033_v8 = vcvt.s32.f32 %v148_v1 }
  0x3c   : > { %v183_v15 = vsub.s32 0, %v148_v1  ;;  %v193_v16 = vsub.s32 1, %v148_v1  ;;  %v143_v25 = vsub.f32 %v133_v6, %v139_v17  ;;  %v144_v26 = vsub.f32 %v134_v7, %v140_v18 }
  0x3d   : > { %v1036_v9 = vadd.s32 %v1030_v2, %v227_v4  ;;  %v1038_v10 = vadd.s32 %v230_v5, %v227_v4  ;;  %v150_v13 = vrot.slane %v133_v6, %v149_v3  ;;  %v154_v14 = vrot.slane %v134_v7, %v149_v3 }
  0x3e   : > { %v180_v24 = vmul.f32 4096.0, %v1033_v8  ;;  %v145_v27 = vadd.f32 %v139_v17, %v133_v6  ;;  %v146_v28 = vadd.f32 %v140_v18, %v134_v7  ;;  %v166_v29 = vrot.slane %v161_v22, %v149_v3 }
  0x3f   : > { %v155_v19 = vmul.f32 %v150_v13, %v133_v6  ;;  %v156_v20 = vmul.f32 %v154_v14, %v134_v7  ;;  %v170_v30 = vrot.slane %v162_v23, %v149_v3  ;;  %v1041_v31 = vrot.slane %v143_v25, %v183_v15 }
  0x40   : > { %v1043_v32 = vrot.slane %v144_v26, %v183_v15  ;;  %v1045_v33 = vrot.slane %v143_v25, %v193_v16  ;;  %v1047_v34 = vrot.slane %v144_v26, %v193_v16  ;;  %vm171_vm4 = vcmp.eq.s32.totalorder %v166_v29, 1 }
  0x41   : > { %vm159_vm2 = vcmp.gt.f32.partialorder %v155_v19, 0.25  ;;  %vm160_vm3 = vcmp.gt.f32.partialorder %v156_v20, 0.25  ;;  %vm172_vm5 = vcmp.eq.s32.totalorder %v170_v30, 1  ;;  %v1049_v35 = vrot.slane %v145_v27, %v183_v15 }
  0x42   : > { %v1051_v36 = vrot.slane %v146_v28, %v183_v15  ;;  %vm173_vm6 = vmand %vm171_vm4, %vm159_vm2  ;;  %v1054_v37 = vadd.f32 %v1041_v31, %v180_v24  ;;  %v1057_v38 = vadd.f32 %v1043_v32, %v180_v24  ;;  %v1060_v39 = vadd.f32 %v1045_v33, %v180_v24 }
  0x43   : > { %vm174_vm7 = vmand %vm172_vm5, %vm160_vm3  ;;  %v175_v40 = vsel %vm173_vm6, %v155_v19, -1.0  ;;  %v1064_v41 = vadd.f32 %v1049_v35, %v180_v24  ;;  %v1069_v43 = vrot.slane %v145_v27, %v193_v16  ;;  %v1072_v45 = vadd.f32 %v1047_v34, %v180_v24 }
  0x44   : > { %v1067_v42 = vadd.f32 %v1051_v36, %v180_v24  ;;  %v176_v44 = vsel %vm174_vm7, %v156_v20, -1.0  ;;  %v1074_v46 = vrot.slane %v146_v28, %v193_v16  ;;  %v235_v47 = vrot.slane %v175_v40, 5  }
  0x45   : > { %v1077_v48 = vadd.f32 %v1069_v43, %v180_v24  ;;  %v221_v49 = vsub.f32 %v1064_v41, %v1054_v37  ;;  %v236_v50 = vrot.slane %v176_v44, 5   ;;  %v1104_v60 = vmov 0.0  }
  0x46   : > { %v1082_v51 = vadd.f32 %v1074_v46, %v180_v24  ;;  %v222_v52 = vsub.f32 %v1067_v42, %v1057_v38  ;;  %v1106_v61 = vmov 0.0   ;;  %v1108_v62 = vmov 0.0  }
  0x47   : > { %v223_v53 = vsub.f32 %v1077_v48, %v1060_v39  ;;  %v1110_v63 = vmov 0.0  }
  0x48   : > { %v224_v54 = vsub.f32 %v1082_v51, %v1072_v45 }
  0x49   : > { %v1090_v55 = vmul.f32 %v223_v53, %v221_v49 }
  0x4a   : > { %v1092_v56 = vmul.f32 %v224_v54, %v222_v52 }
  0x4b LB: >> { %vm254_vm8 = vcmask 1042432   ;;  %v391_v14 = vstv %s900_s26  ;;  %s244_s26 = sadd.s32 1, %s900_s26   ;;  %s900_s26 = sphi %s1116_s26, %s244_s26   ;;  %v896_v47 = vphi %v235_v47, %v433_v47   ;;  %v892_v50 = vphi %v236_v50, %v434_v50   ;;  %v888_v63 = vphi %v1110_v63, %v1370_v63   ;;  %v884_v62 = vphi %v1108_v62, %v1369_v62   ;;  %v880_v61 = vphi %v1106_v61, %v1368_v61   ;;  %v876_v60 = vphi %v1104_v60, %v1367_v60   ;;  %v872_v59 = vphi %v1102_v59, %v1366_v59   ;;  %v868_v58 = vphi %v1100_v58, %v1365_v58   ;;  %v864_v57 = vphi %v1098_v57, %v1364_v57  }
  0x4c   : >> { %v255_v0 = vsel %vm254_vm8, %v896_v47, -inf  ;;  %v256_v1 = vsel %vm254_vm8, %v892_v50, -inf  ;;  %vm392_vm9 = vcmp.eq.s32.totalorder %v1030_v2, %v391_v14  ;;  %p241_p6 = scmp.ge.s32.totalorder %s244_s26, 128  }
  0x4d   : >> { %v257_v3 = vmax.f32 %v255_v0, %v256_v1  ;;  %s578_s5 = sshll.u32 (%p241_p6), %s937_s10, 7  ;;  %s464_s11 = sshll.u32 (%p241_p6), %s1096_s17, 4  ;;  %s1298_s11 = int_to_ptr.vmem [resolvable:$true] %s464_s11 }
  0x4e   : > { %s1296_s16 = scalar_lea.hbm (%p241_p6), %s1342_s1, %s578_s5  ;;  %s451_s10 = scalar_lea.sflag (%p241_p6), [#allocation4], %s1021_s21 }
  0x4f   : >> { %258 = vmax.xlane.f32.xlu0 %v257_v3  ;;  %s754_s20 = scalar_lea.vmem (%p241_p6), %s1298_s11, 128  ;;  %p1371_p12 = scmp.ne.s32.totalorder (%p241_p6), %s1346_s18, 0 }
  0x50   : > { %p755_p11 = scmp.ne.s32.totalorder (%p241_p6), %s1298_s11, %s754_s20  ;;  %s905_s22 = smov (%p241_p6), [#allocation5]  }
  0x51   : > { %s758_s23 = sshll.u32 (%p241_p6), %s905_s22, 4  ;;  %s759_s23 = int_to_ptr.vmem [resolvable:$false] %s758_s23 }
  0x52   : > { %p756_p13 = pnand (%p241_p6), %p755_p11, %p1371_p12  ;;  %s760_s24 = scalar_lea.vmem (%p241_p6), %s759_s23, 256 }
  0x53   : > { %p761_p10 = scmp.lt.s32.totalorder (%p241_p6), %s1298_s11, %s759_s23  ;;  %p762_p2 = scmp.lt.s32.totalorder (%p241_p6), %s760_s24, %s754_s20 }
  0x54   : > { %p757_p7 = pneg (%p241_p6), %p756_p13 }
  0x55   : > { %p763_p4 = por (%p241_p6), %p762_p2, %p761_p10 }
  0x57   : > { %p764_p5 = pnand (%p241_p6), %p763_p4, %p757_p7 }
  0xdc   : >> { %v259_v4 = vpop.xlane.xlu0 %258 }
  0xdd   : >> { %v260_v5 = vrot.slane %v259_v4, 4 }
  0xdf   : >> { %v261_v6 = vmax.f32 %v259_v4, %v260_v5 }
  0xe1   : >> { %v262_v7 = vrot.slane %v261_v6, 2 }
  0xe3   : >> { %v263_v11 = vmax.f32 %v261_v6, %v262_v7  ;;  %v904_v6 = vmov 0.0  }
  0xe5   : >> { %v264_v12 = vrot.slane %v263_v11, 1 }
  0xe7   : >> { %v265_v13 = vmax.f32 %v263_v11, %v264_v12 }
  0xe9   : >> { %582 = vpush %v265_v13 }
 0x11a   : >> { %s583_s27 = spop %582 }
 0x11b   : >> { %v1150_v15 = vstv %s583_s27 }
 0x11c   : >> { %vm268_vm10 = vcmp.gt.f32.partialorder %v1150_v15, 0.0  ;;  %vm269_vm11 = vcmp.eq.f32.partialorder %v896_v47, %v1150_v15  ;;  %vm270_vm12 = vcmp.eq.f32.partialorder %v892_v50, %v1150_v15 }
 0x11d   : >> { %v271_v16 = vsel %vm269_vm11, %v1036_v9, 768  ;;  %v272_v17 = vsel %vm270_vm12, %v1038_v10, 768  ;;  %vm1161_vm13 = vmand %vm392_vm9, %vm268_vm10 }
 0x11e   : >> { %v1168_v59 = vsel %vm1161_vm13, %v1150_v15, %v872_v59   ;;  %v1172_v57 = vsel %vm1161_vm13, 1.0, %v864_v57   ;;  %v273_v21 = vsel %vm254_vm8, %v271_v16, 2147483647  ;;  %v274_v22 = vsel %vm254_vm8, %v272_v17, 2147483647 }
 0x11f   : >> { %v1353_v19 = vmov %v1168_v59  ;;  %v1354_v20 = vmov %v1172_v57  ;;  %vm275_vm14 = vcmp.lt.s32.totalorder %v273_v21, %v274_v22 }
 0x120   : >> { %v276_v23 = vsel %vm275_vm14, %v273_v21, %v274_v22  ;;  %vm441_vm14 = vcmask (%p241_p6), 1043456  }
 0x121   : >> { %v278_v24 = vshra.s32 %v276_v23, 16  ;;  %v277_v26 = vand.u32 65535, %v276_v23 }
 0x123   : >> { %v280_v25 = vcvt.s32.f32 %v278_v24  ;;  %v279_v28 = vcvt.s32.f32 %v277_v26 }
 0x125   : >> { %281 = vmin.xlane.f32.xlu0 %v280_v25 }
 0x1b2   : >> { %v282_v27 = vpop.xlane.xlu0 %281 }
 0x1b3   : >> { %vm283_vm15 = vcmp.eq.f32.partialorder %v280_v25, %v282_v27  ;;  %v288_v30 = vcvt.f32.s32 %v282_v27 }
 0x1b4   : >> { %v284_v29 = vsel %vm283_vm15, %v279_v28, inf  ;;  %vm443_vm15 = vcmask (%p241_p6), 1044480  }
 0x1b5   : >> { %285 = vmin.xlane.f32.xlu1 %v284_v29  ;;  %v289_v44 = vshll.u32 %v288_v30, 16 }
 0x242   : >> { %v286_v40 = vpop.xlane.xlu1 %285 }
 0x243   : >> { %v287_v49 = vcvt.f32.s32 %v286_v40 }
 0x245   : >> { %v290_v52 = vadd.s32 %v289_v44, %v287_v49 }
 0x247   : >> { %v291_v53 = vrot.slane %v290_v52, 4 }
 0x249   : >> { %vm292_vm0 = vcmp.lt.s32.totalorder %v290_v52, %v291_v53 }
 0x24a   : >> { %v293_v54 = vsel %vm292_vm0, %v290_v52, %v291_v53  ;;  %vm445_vm0 = vcmask (%p241_p6), 1045504  }
 0x24b   : >> { %v294_v57 = vrot.slane %v293_v54, 2 }
 0x24d   : >> { %vm295_vm1 = vcmp.lt.s32.totalorder %v293_v54, %v294_v57 }
 0x24e   : >> { %v296_v59 = vsel %vm295_vm1, %v293_v54, %v294_v57  ;;  %vm447_vm1 = vcmask (%p241_p6), 1046528  }
 0x24f   : >> { %v297_v0 = vrot.slane %v296_v59, 1 }
 0x251   : >> { %vm298_vm2 = vcmp.lt.s32.totalorder %v296_v59, %v297_v0 }
 0x252   : >> { %v299_v1 = vsel %vm298_vm2, %v296_v59, %v297_v0 }
 0x253   : >> { %584 = vpush %v299_v1 }
 0x284   : >> { %s585_s28 = spop %584 }
 0x285   : >> { %v301_v3 = vstv %s585_s28 }
 0x286   : >> { %vm1177_vm3 = vcmp.eq.s32.totalorder %v1036_v9, %v301_v3  ;;  %vm1182_vm4 = vcmp.eq.s32.totalorder %v1038_v10, %v301_v3 }
 0x287   : >> { %v575_v7 = vsel %vm1177_vm3, 1.0, %v904_v6  ;;  %v576_v11 = vsel %vm1182_vm4, 1.0, %v904_v6 }
 0x288   : >> { %v323_v12 = vmul.f32 %v575_v7, %v1045_v33  ;;  %v324_v13 = vmul.f32 %v576_v11, %v1047_v34  ;;  %v308_v14 = vmul.f32 %v575_v7, %v1041_v31  ;;  %v309_v16 = vmul.f32 %v576_v11, %v1043_v32 }
 0x289   : >> { %v353_v17 = vmul.f32 %v575_v7, %v1069_v43  ;;  %v354_v21 = vmul.f32 %v576_v11, %v1074_v46  ;;  %v338_v22 = vmul.f32 %v575_v7, %v1049_v35  ;;  %v339_v23 = vmul.f32 %v576_v11, %v1051_v36 }
 0x28a   : >> { %v325_v24 = vsel %vm254_vm8, %v323_v12, 0.0  ;;  %v326_v25 = vsel %vm254_vm8, %v324_v13, 0.0  ;;  %v310_v26 = vsel %vm254_vm8, %v308_v14, 0.0  ;;  %v311_v27 = vsel %vm254_vm8, %v309_v16, 0.0 }
 0x28b   : >> { %v327_v28 = vadd.f32 %v326_v25, %v325_v24  ;;  %v312_v29 = vadd.f32 %v311_v27, %v310_v26  ;;  %v355_v30 = vsel %vm254_vm8, %v353_v17, 0.0  ;;  %v356_v40 = vsel %vm254_vm8, %v354_v21, 0.0 }
 0x28c   : >> { %v340_v44 = vsel %vm254_vm8, %v338_v22, 0.0  ;;  %v341_v49 = vsel %vm254_vm8, %v339_v23, 0.0  ;;  %v368_v52 = vmul.f32 %v575_v7, %v1033_v8  ;;  %v369_v53 = vmul.f32 %v576_v11, %v1033_v8 }
 0x28d   : >> { %328 = vadd.xlane.f32.xlu0 %v327_v28  ;;  %313 = vadd.xlane.f32.xlu1 %v312_v29  ;;  %v357_v54 = vadd.f32 %v356_v40, %v355_v30  ;;  %v342_v57 = vadd.f32 %v341_v49, %v340_v44 }
 0x28e   : >> { %v370_v59 = vsel %vm254_vm8, %v368_v52, 0.0  ;;  %v371_v0 = vsel %vm254_vm8, %v369_v53, 0.0 }
 0x28f   : >> { %v372_v1 = vadd.f32 %v371_v0, %v370_v59 }
 0x291   : >> { %358 = vadd.xlane.f32.xlu0 %v357_v54  ;;  %343 = vadd.xlane.f32.xlu1 %v342_v57 }
 0x295   : >> { %373 = vadd.xlane.f32.xlu1 %v372_v1 }
 0x31a   : >> { %v329_v3 = vpop.xlane.xlu0 %328  ;;  %v314_v6 = vpop.xlane.xlu1 %313 }
 0x31b   : >> { %v330_v12 = vrot.slane %v329_v3, 4  ;;  %v315_v13 = vrot.slane %v314_v6, 4 }
 0x31d   : >> { %v331_v14 = vadd.f32 %v330_v12, %v329_v3  ;;  %v316_v7 = vadd.f32 %v315_v13, %v314_v6 }
 0x31e   : >> { %v359_v16 = vpop.xlane.xlu0 %358  ;;  %v344_v17 = vpop.xlane.xlu1 %343 }
 0x31f   : >> { %v332_v21 = vrot.slane %v331_v14, 2  ;;  %v317_v11 = vrot.slane %v316_v7, 2  ;;  %v360_v22 = vrot.slane %v359_v16, 4  ;;  %v345_v23 = vrot.slane %v344_v17, 4 }
 0x321   : >> { %v361_v24 = vadd.f32 %v360_v22, %v359_v16  ;;  %v346_v25 = vadd.f32 %v345_v23, %v344_v17  ;;  %v318_v26 = vadd.f32 %v317_v11, %v316_v7  ;;  %v333_v27 = vadd.f32 %v332_v21, %v331_v14 }
 0x322   : >> { %v374_v28 = vpop.xlane.xlu1 %373 }
 0x323   : >> { %v362_v29 = vrot.slane %v361_v24, 2  ;;  %v347_v30 = vrot.slane %v346_v25, 2  ;;  %v375_v40 = vrot.slane %v374_v28, 4  ;;  %v319_v44 = vrot.slane %v318_v26, 1 }
 0x324   : >> { %v334_v49 = vrot.slane %v333_v27, 1 }
 0x325   : >> { %v363_v52 = vadd.f32 %v362_v29, %v361_v24  ;;  %v376_v53 = vadd.f32 %v375_v40, %v374_v28  ;;  %v320_v54 = vadd.f32 %v319_v44, %v318_v26  ;;  %v348_v57 = vadd.f32 %v347_v30, %v346_v25 }
 0x326   : >> { %v335_v59 = vadd.f32 %v334_v49, %v333_v27 }
 0x327   : >> { %v377_v0 = vrot.slane %v376_v53, 2  ;;  %586 = vpush %v320_v54  ;;  %v349_v1 = vrot.slane %v348_v57, 1  ;;  %v364_v3 = vrot.slane %v363_v52, 1 }
 0x328   : >> { %588 = vpush %v335_v59 }
 0x329   : >> { %v378_v6 = vadd.f32 %v377_v0, %v376_v53  ;;  %v350_v12 = vadd.f32 %v349_v1, %v348_v57  ;;  %v365_v13 = vadd.f32 %v364_v3, %v363_v52 }
 0x32b   : >> { %590 = vpush %v350_v12  ;;  %v379_v14 = vrot.slane %v378_v6, 1 }
 0x32c   : >> { %592 = vpush %v365_v13 }
 0x32d   : >> { %v380_v7 = vadd.f32 %v379_v14, %v378_v6 }
 0x32f   : >> { %594 = vpush %v380_v7 }
 0x358   : >> { %s587_s29 = spop %586 }
 0x359   : >> { %v322_v16 = vstv %s587_s29  ;;  %s589_s30 = spop %588 }
 0x35a   : >> { %v1213_v63 = vsel %vm1161_vm13, %v322_v16, %v888_v63   ;;  %v337_v21 = vstv %s589_s30 }
 0x35b   : >> { %v1359_v17 = vmov %v1213_v63  ;;  %v1218_v62 = vsel %vm1161_vm13, %v337_v21, %v884_v62  }
 0x35c   : >> { %v1360_v11 = vmov %v1218_v62  ;;  %s591_s2 = spop %590 }
 0x35d   : >> { %v352_v22 = vstv %s591_s2  ;;  %s593_s3 = spop %592 }
 0x35e   : >> { %v1223_v61 = vsel %vm1161_vm13, %v352_v22, %v880_v61   ;;  %v367_v24 = vstv %s593_s3 }
 0x35f   : >> { %v1361_v23 = vmov %v1223_v61  ;;  %v1228_v60 = vsel %vm1161_vm13, %v367_v24, %v876_v60  }
 0x360   : >> { %v1362_v25 = vmov %v1228_v60  ;;  %s595_s4 = spop %594 }
 0x361   : >> { %v382_v63 = vstv %s595_s4 }
 0x362   : >> { %v383_v26 = vmul.f32 4096.0, %v382_v63  ;;  %v1233_v58 = vsel %vm1161_vm13, %v382_v63, %v868_v58   ;;  %vm437_vm13 = vcmask (%p241_p6), 1041408  }
 0x363   : >> { %v1363_v27 = vmov %v1233_v58 }
 0x364   : >> { %v384_v62 = vadd.f32 %v383_v26, %v322_v16  ;;  %v385_v28 = vadd.f32 %v383_v26, %v337_v21  ;;  %v386_v29 = vadd.f32 %v383_v26, %v352_v22  ;;  %v387_v30 = vadd.f32 %v383_v26, %v367_v24 }
 0x366   : >> { %v388_v40 = vsub.f32 %v386_v29, %v384_v62  ;;  %v389_v61 = vsub.f32 %v387_v30, %v385_v28  ;;  %v403_v44 = vmax.f32 %v1054_v37, %v384_v62  ;;  %v404_v49 = vmax.f32 %v1057_v38, %v384_v62 }
 0x367   : >> { %v405_v60 = vmax.f32 %v1060_v39, %v385_v28  ;;  %v406_v52 = vmax.f32 %v1072_v45, %v385_v28  ;;  %v407_v53 = vmin.f32 %v1064_v41, %v386_v29  ;;  %v408_v18 = vmin.f32 %v1067_v42, %v386_v29 }
 0x368   : >> { %v409_v58 = vmin.f32 %v1077_v48, %v387_v30  ;;  %v410_v54 = vmin.f32 %v1082_v51, %v387_v30  ;;  %v390_v0 = vmul.f32 %v389_v61, %v388_v40  ;;  %v1368_v61 = vmov %v1361_v23 }
 0x369   : >> { %v411_v57 = vsub.f32 %v407_v53, %v403_v44  ;;  %v412_v59 = vsub.f32 %v408_v18, %v404_v49 }
 0x36a   : >> { %v415_v1 = vsub.f32 %v409_v58, %v405_v60  ;;  %v416_v3 = vsub.f32 %v410_v54, %v406_v52  ;;  %v421_v21 = vadd.f32 %v390_v0, %v1090_v55  ;;  %v422_v22 = vadd.f32 %v390_v0, %v1092_v56 }
 0x36b   : >> { %v413_v6 = vmax.f32 %v411_v57, 0.0  ;;  %v414_v12 = vmax.f32 %v412_v59, 0.0  ;;  %v1364_v57 = vmov %v1354_v20  ;;  %v1365_v58 = vmov %v1363_v27 }
 0x36c   : >> { %v417_v13 = vmax.f32 %v415_v1, 0.0  ;;  %v418_v14 = vmax.f32 %v416_v3, 0.0  ;;  %v1366_v59 = vmov %v1353_v19  ;;  %v1367_v60 = vmov %v1362_v25 }
 0x36e   : >> { %v419_v7 = vmul.f32 %v417_v13, %v413_v6  ;;  %v420_v16 = vmul.f32 %v418_v14, %v414_v12 }
 0x370   : >> { %v423_v24 = vsub.f32 %v421_v21, %v419_v7  ;;  %v424_v63 = vsub.f32 %v422_v22, %v420_v16 }
 0x372   : >> { %v425_v26 = vmul.f32 0.45, %v423_v24  ;;  %v426_v62 = vmul.f32 0.45, %v424_v63  ;;  %v1370_v63 = vmov %v1359_v17 }
 0x373   : > { %243 = sbr.rel (!%p241_p6) target bundleno = 75 (0x4b), region = 76 }
 0x374   : >> { %vm427_vm5 = vcmp.gt.f32.partialorder %v419_v7, %v425_v26  ;;  %vm428_vm6 = vcmp.gt.f32.partialorder %v420_v16, %v426_v62  ;;  %v1369_v62 = vmov %v1360_v11 }
 0x375   : >> { %vm429_vm7 = vmand %vm268_vm10, %vm427_vm5 }
 0x376   : >> { %vm430_vm9 = vmand %vm268_vm10, %vm428_vm6  ;;  %vm435_vm10 = vcmask (%p241_p6), 1040384  }
 0x377   : >> { %vm431_vm11 = vmor %vm429_vm7, %vm1177_vm3  ;;  %v436_v15 = vsel (%p241_p6), %vm435_vm10, %v1359_v17, %v1360_v11 }
 0x378   : >> { %vm432_vm12 = vmor %vm430_vm9, %vm1182_vm4  ;;  %v433_v47 = vsel %vm431_vm11, -1.0, %v896_v47   ;;  %v438_v4 = vsel (%p241_p6), %vm437_vm13, %v436_v15, %v1361_v23 }
 0x379   : >> { %v434_v50 = vsel %vm432_vm12, -1.0, %v892_v50   ;;  %v440_v47 = vsel (%p241_p6), %vm254_vm8, %v438_v4, %v1362_v25 }
 0x37a   : > { %v442_v2 = vsel %vm441_vm14, %v440_v47, %v1353_v19 }
 0x37b   : > { %v444_v8 = vsel %vm443_vm15, %v442_v2, %v1363_v27 }
 0x37c   : > { %v446_v9 = vsel %vm445_vm0, %v444_v8, %v1354_v20 }
 0x37d   : > { %v448_v10 = vsel %vm447_vm1, %v446_v9, 0.0 }
 0x37e   : > { %449 = vst [vmem:[%s1096_s17] sm:$0xff] %v448_v10 }
 0x37f   : > { %767 = shalt.err (!%p764_p5)
}
 0x380   : > { %s768_s21 = scalar_lea.hbm %s1296_s16, 128  ;;  %s772_s26 = scalar_lea.hbm %s1342_s1, 256 }
 0x381   : > { %p769_p8 = scmp.ne.s32.totalorder %s1296_s16, %s768_s21  ;;  %p773_p1 = scmp.lt.u32.totalorder %s1296_s16, %s1342_s1 }
 0x382   : > { %p774_p3 = scmp.lt.u32.totalorder %s772_s26, %s768_s21  ;;  %p776_p11 = scmp.lt.u32.totalorder %s768_s21, %s1296_s16 }
 0x383   : > { %p770_p9 = pnand %p769_p8, %p1371_p12 }
 0x384   : > { %p775_p6 = por %p774_p3, %p773_p1 }
 0x385   : > { %p771_p0 = pneg %p770_p9 }
 0x386   : > { %p777_p13 = por %p776_p11, %p775_p6 }
 0x388   : > { %p778_p7 = pnand %p777_p13, %p771_p0 }
 0x38a   : > { %781 = shalt.err (!%p778_p7)
}
 0x38b   : > { %598 = dma.vmem_to_hbm [thread:$0]  (%p1371_p12), %s1298_s11, 128, %s1296_s16, %s451_s10  }
 0x38c PF: > { %s476_s29 = sand.u32 1, %s848_s6   ;;  %p1372_p10 = scmp.ne.s32.totalorder %s1347_s19, 0 }
 0x38d   : > { %p1373_p2 = scmp.ge.s32.totalorder %s860_s9, 2  ;;  %s477_s30 = scalar_lea.sflag [#allocation4], %s476_s29 }
 0x38f   : > { %p605_p4 = pnand %p1373_p2, %p1372_p10 }
 0x391   : > { %843 = dma.done.wait (!%p605_p4), %s477_s30, 128  }
 0x392   : > { %845 = vsyncadd (!%p605_p4), %s477_s30, 4294967168  ;;  %p14_p5 = scmp.ge.s32.totalorder %s941_s12, 4   ;;  %s1374_s6 = smov %s852_s7 }
 0x393   : > { %s1375_s7 = smov %s856_s8  ;;  %s1376_s8 = smov %s953_s15 }
 0x394   : > { %s1377_s9 = smov %s941_s12  ;;  %16 = sbr.rel (!%p14_p5) target bundleno = 5 (0x5), region = 87 }
 0x39b   :  { %482 = vsyncpa [#allocation3], 1 }
 0x39c   :  { %484 = vsyncpa [#allocation3 + $0x1], 1 }
 0x39d   :  { %485 = vsyncpa [#allocation4], 1 }
 0x39e   :  { %487 = vsyncpa [#allocation4 + $0x1], 1 }

</bundles_post_ra>
